<compile_context>
chip_gen: v7x
topology: tpu7x:2x2x1
jax: 0.10.0
libtpu: 0.0.40
codegen_flags: <defaults>
</compile_context>

<pallas_src>
import functools

import jax
import jax.numpy as jnp
from jax.experimental import pallas as pl
from jax.experimental.pallas import tpu as pltpu

_MiB = 1024 * 1024


def _round_up(a, b):
    return (a + b - 1) // b * b


def _vmem_budgets():
    """Return (x-stream VMEM budget, vmem_limit_bytes) for this chip generation."""
    cap = None
    try:
        if hasattr(pltpu, "get_tpu_info"):
            cap = int(pltpu.get_tpu_info().vmem_capacity_bytes)
    except Exception:
        cap = None
    if cap is None:
        try:
            kind = jax.devices()[0].device_kind.lower()
            cap = 64 * _MiB if "v7" in kind else 128 * _MiB
        except Exception:
            cap = 64 * _MiB  # conservative default
    if cap >= 128 * _MiB:
        # v5e / v6e: plenty of VMEM headroom -> big tiles, high scoped limit.
        return 40 * _MiB, 100 * _MiB
    # v7x (64 MiB physical per TC): keep headroom but never starve tile_n.
    return 22 * _MiB, 56 * _MiB


def _dimension_semantics(num_tiles):
    """Prefer CORE_PARALLEL on v7x so both TensorCores shard the token tiles."""
    sem = "parallel"
    try:
        kind = jax.devices()[0].device_kind.lower()
        if "v7" in kind and num_tiles >= 2 and hasattr(pltpu, "CORE_PARALLEL"):
            sem = pltpu.CORE_PARALLEL
    except Exception:
        pass
    return (sem,)


def _router_kernel(x_ref, w_ref, probs_ref, idx_ref, val_ref, *, top_k,
                   probs_token_major):
    # x_ref: (tile_n, D) activations; w_ref: (E, D) gate weight (nn.Linear layout).
    # Outputs (lane-dense):
    #   probs_ref (E, tile_n) f32   [or (tile_n, E) when probs_token_major]
    #   idx_ref   (K, tile_n) i32
    #   val_ref   (K, tile_n) f32
    e = w_ref.shape[0]
    tn = x_ref.shape[0]

    # logits_t[e, t] = sum_d w[e, d] * x[t, d]  -> (E, tile_n), f32 accumulation.
    # Native-dtype operands straight into the MXU; no explicit transpose op.
    logits_t = jnp.einsum("ed,td->et", w_ref[...], x_ref[...],
                          preferred_element_type=jnp.float32)

    row_ids = jax.lax.broadcasted_iota(jnp.int32, (e, tn), 0)  # expert id per row
    neg_inf = jnp.float32(-jnp.inf)

    remaining = logits_t
    num = jnp.zeros((e, tn), jnp.float32)   # softmax numerator, built in place
    m0 = None                               # top-1 value == softmax max
    denom = None                            # sum_k exp(val_k - val_0)
    idx_rows = []
    val_rows = []

    for k in range(top_k):                  # small static unroll
        m = jnp.max(remaining, axis=0, keepdims=True)              # (1, tile_n)
        is_max = remaining == m
        # ties -> smallest expert index (torch.topk tie order is impl-defined)
        sel_idx = jnp.min(jnp.where(is_max, row_ids, e), axis=0, keepdims=True)
        sel = row_ids == sel_idx                                   # one-hot (E, tile_n)

        if k == 0:
            m0 = m
            w_k = jnp.ones_like(m)          # exp(val_0 - val_0) == 1
            denom = jnp.ones_like(m)
        else:
            w_k = jnp.exp(m - m0)
            denom = denom + w_k

        num = jnp.where(sel, w_k, num)
        remaining = jnp.where(sel, neg_inf, remaining)

        idx_rows.append(sel_idx)            # keep in registers; store once below
        val_rows.append(m)

    # One lane-dense (K, tile_n) store per output instead of K masked row stores.
    idx_ref[...] = jnp.concatenate(idx_rows, axis=0)
    val_ref[...] = jnp.concatenate(val_rows, axis=0)

    probs = num * pl.reciprocal(denom, approx=False)
    if probs_token_major:
        # In-kernel XLU transpose (hidden under the x DMA); avoids the
        # wrapper-side HBM transpose when E is itself lane-dense.
        probs_ref[...] = probs.T
    else:
        probs_ref[...] = probs


def router_forward(x, w_gate, *, top_k, tile_n=None):
    """x: (B, T, D); w_gate: (E, D) (nn.Linear weight layout, no bias)."""
    B, T, D = x.shape
    E, D2 = w_gate.shape
    assert D2 == D
    N = B * T

    itemsize = jnp.dtype(x.dtype).itemsize
    x_budget, vmem_limit = _vmem_budgets()

    # probs layout: token-major (in-kernel transpose) only when E is lane-dense.
    probs_token_major = (E >= 128) and (E % 128 == 0)

    # Byte-driven row-tile size: target >= 8 MiB of x per tile, capped so the
    # double-buffered x stream + outputs + (double-buffered) gate weight stay
    # within this generation's VMEM budget.
    bytes_per_row_in = D * itemsize
    bytes_per_row_out = (E + 2 * top_k) * 4          # probs f32 + idx i32 + val f32
    w_bytes = E * D * itemsize
    budget = max(2 * _MiB, x_budget - 2 * w_bytes)
    max_rows = budget // (2 * (bytes_per_row_in + bytes_per_row_out))
    max_rows = max(128, (max_rows // 128) * 128)
    if tile_n is None:
        tile_n = max(1024, (8 * _MiB) // max(1, bytes_per_row_in))
    tile_n = min(tile_n, max_rows, 8192)
    tile_n = max(128, (tile_n // 128) * 128)         # lane-aligned output blocks

    if N <= tile_n:
        tile_n = _round_up(N, 128)                   # single, lane-dense tile
    n_pad = _round_up(N, tile_n)

    x2 = x.reshape(N, D)
    if n_pad != N:
        x2 = jnp.pad(x2, ((0, n_pad - N), (0, 0)))   # padded rows sliced off below

    kernel = functools.partial(_router_kernel, top_k=top_k,
                               probs_token_major=probs_token_major)

    num_tiles = n_pad // tile_n

    # Grid-invariant gate weight: single-buffer it when it is big enough to
    # matter (recovers VMEM that converts directly into larger tile_n).
    if w_bytes >= 1 * _MiB and hasattr(pl, "Buffered"):
        w_spec = pl.BlockSpec((E, D), lambda i: (0, 0), pipeline_mode=pl.Buffered(1))
    else:
        w_spec = pl.BlockSpec((E, D), lambda i: (0, 0))

    if probs_token_major:
        probs_shape = jax.ShapeDtypeStruct((n_pad, E), jnp.float32)
        probs_spec = pl.BlockSpec((tile_n, E), lambda i: (i, 0))
    else:
        probs_shape = jax.ShapeDtypeStruct((E, n_pad), jnp.float32)
        probs_spec = pl.BlockSpec((E, tile_n), lambda i: (0, i))

    probs_out, idx_t, val_t = pl.pallas_call(
        kernel,
        out_shape=(
            probs_shape,
            jax.ShapeDtypeStruct((top_k, n_pad), jnp.int32),
            jax.ShapeDtypeStruct((top_k, n_pad), jnp.float32),
        ),
        grid_spec=pltpu.PrefetchScalarGridSpec(
            num_scalar_prefetch=0,
            grid=(num_tiles,),
            in_specs=[
                pl.BlockSpec((tile_n, D), lambda i: (i, 0)),   # stream x row-tiles
                w_spec,                                        # gate weight (grid-invariant)
            ],
            out_specs=[
                probs_spec,
                pl.BlockSpec((top_k, tile_n), lambda i: (0, i)),
                pl.BlockSpec((top_k, tile_n), lambda i: (0, i)),
            ],
        ),
        compiler_params=pltpu.CompilerParams(
            dimension_semantics=_dimension_semantics(num_tiles),
            vmem_limit_bytes=vmem_limit,
        ),
    )(x2, w_gate)

    if probs_token_major:
        router_probs = probs_out[:N].reshape(B, T, E)
    else:
        # Small-E path: transpose the tiny probs output in the wrapper.
        router_probs = probs_out[:, :N].T.reshape(B, T, E)
    top_k_indices = idx_t[:, :N].T.reshape(B, T, top_k)
    top_k_logits = val_t[:, :N].T.reshape(B, T, top_k)
    # exp_mask (one-hot of top_k_indices, permuted) is cheap glue derivable
    # from top_k_indices; the torch forward is truncated after computing it.
    # TODO(synk): noisy top-k, compute_router_z_loss / compute_aux_loss /
    # get_capacity are config-off or undefined in the provided module, so
    # those branches are omitted.
    return router_probs, top_k_indices, top_k_logits


def _reference(x, w_gate, top_k):
    logits = jnp.einsum("btd,ed->bte", x, w_gate)
    vals, idx = jax.lax.top_k(logits, top_k)
    masked = jnp.full_like(logits, -jnp.inf)
    oh = jax.nn.one_hot(idx, logits.shape[-1], dtype=bool).any(axis=-2)
    masked = jnp.where(oh, logits, masked)
    return jax.nn.softmax(masked, axis=-1), idx, vals


if __name__ == "__main__":
    # Small config consistent with the module: n_embd=32, num_experts=8, top_k=2
    B, T, D, E, K = 2, 8, 32, 8, 2

    key = jax.random.PRNGKey(0)
    kx, kw = jax.random.split(key)
    x = jax.random.normal(kx, (B, T, D), dtype=jnp.float32)
    # nn.Linear(config.n_embd, config.num_experts, bias=False).weight -> (E, D)
    w_gate = (jax.random.uniform(kw, (E, D), dtype=jnp.float32) - 0.5) * (2.0 / jnp.sqrt(D))

    probs, idx, vals = router_forward(x, w_gate, top_k=K)
    jax.block_until_ready((probs, idx, vals))

    # sanity check against a pure-JAX reference
    ref_probs, ref_idx, ref_vals = _reference(x, w_gate, K)
    assert jnp.allclose(probs, ref_probs, atol=1e-5), "probs mismatch"
    assert jnp.allclose(jnp.sort(vals, -1), jnp.sort(ref_vals, -1), atol=1e-5), "topk vals mismatch"
    assert jnp.all(jnp.sort(idx, -1) == jnp.sort(ref_idx, -1)), "topk idx mismatch"

    print("KERNEL_OK")
</pallas_src>

<mosaic_0001>
module attributes {stable_mosaic.version = 11 : i64} {
  func.func @_router_kernel(%arg0: i32, %arg1: memref<128x32xf32, #tpu.memory_space<vmem>>, %arg2: memref<8x32xf32, #tpu.memory_space<vmem>>, %arg3: memref<8x128xf32, #tpu.memory_space<vmem>>, %arg4: memref<2x128xi32, #tpu.memory_space<vmem>>, %arg5: memref<2x128xf32, #tpu.memory_space<vmem>>) attributes {dimension_semantics = [#tpu.dimension_semantics<parallel>], iteration_bounds = array<i64: 1>, scalar_prefetch = 0 : i64, scratch_operands = 0 : i64, tpu.core_type = #tpu.core_type<tc>, window_params = [{transform_indices = @transform_0, window_bounds = array<i64: 128, 32>}, {pipeline_mode = #tpu.pipeline_mode<synchronous>, transform_indices = @transform_1, window_bounds = array<i64: 8, 32>}, {transform_indices = @transform_2, window_bounds = array<i64: 8, 128>}, {transform_indices = @transform_3, window_bounds = array<i64: 2, 128>}, {transform_indices = @transform_4, window_bounds = array<i64: 2, 128>}]} {
    %c0 = arith.constant 0 : index
    %c0_0 = arith.constant 0 : index
    %0 = vector.load %arg2[%c0, %c0_0] : memref<8x32xf32, #tpu.memory_space<vmem>>, vector<8x32xf32>
    %c0_1 = arith.constant 0 : index
    %c0_2 = arith.constant 0 : index
    %1 = vector.load %arg1[%c0_1, %c0_2] : memref<128x32xf32, #tpu.memory_space<vmem>>, vector<128x32xf32>
    "tpu.trace_start"() <{level = 10 : i32, message = "ed,td->et"}> : () -> ()
    %cst = arith.constant dense<0.000000e+00> : vector<8x128xf32>
    %2 = tpu.matmul %0, %1, %cst {dimension_numbers = #tpu.dot_dimension_numbers<[1], [1], [0], [0], [0, 0, 1, 0], [], []>} : vector<8x32xf32>, vector<128x32xf32>, vector<8x128xf32> -> vector<8x128xf32>
    "tpu.trace_stop"() : () -> ()
    %3 = tpu.iota {dimensions = array<i32: 0>} : vector<8x128xi32>
    %cst_3 = arith.constant 0.000000e+00 : f32
    %4 = vector.broadcast %cst_3 : f32 to vector<8x128xf32>
    %cst_4 = arith.constant dense<0xFF800000> : vector<128xf32>
    %5 = vector.multi_reduction <maximumf>, %2, %cst_4 [0] : vector<8x128xf32> to vector<128xf32>
    %6 = vector.shape_cast %5 : vector<128xf32> to vector<1x128xf32>
    %7 = vector.broadcast %6 : vector<1x128xf32> to vector<8x128xf32>
    %8 = arith.cmpf oeq, %2, %7 : vector<8x128xf32>
    %c8_i32 = arith.constant 8 : i32
    %9 = vector.broadcast %c8_i32 : i32 to vector<8x128xi32>
    %10 = arith.select %8, %3, %9 : vector<8x128xi1>, vector<8x128xi32>
    %cst_5 = arith.constant dense<2147483647> : vector<128xi32>
    %11 = vector.multi_reduction <minsi>, %10, %cst_5 [0] : vector<8x128xi32> to vector<128xi32>
    %12 = vector.shape_cast %11 : vector<128xi32> to vector<1x128xi32>
    %13 = vector.broadcast %12 : vector<1x128xi32> to vector<8x128xi32>
    %14 = arith.cmpi eq, %3, %13 : vector<8x128xi32>
    %cst_6 = arith.constant 1.000000e+00 : f32
    %15 = vector.broadcast %cst_6 : f32 to vector<1x128xf32>
    %cst_7 = arith.constant 1.000000e+00 : f32
    %16 = vector.broadcast %cst_7 : f32 to vector<1x128xf32>
    %17 = vector.shape_cast %15 : vector<1x128xf32> to vector<1x128xf32>
    %18 = vector.broadcast %17 : vector<1x128xf32> to vector<8x128xf32>
    %19 = arith.select %14, %18, %4 : vector<8x128xi1>, vector<8x128xf32>
    %cst_8 = arith.constant 0xFF800000 : f32
    %20 = vector.broadcast %cst_8 : f32 to vector<8x128xf32>
    %21 = arith.select %14, %20, %2 : vector<8x128xi1>, vector<8x128xf32>
    %cst_9 = arith.constant dense<0xFF800000> : vector<128xf32>
    %22 = vector.multi_reduction <maximumf>, %21, %cst_9 [0] : vector<8x128xf32> to vector<128xf32>
    %23 = vector.shape_cast %22 : vector<128xf32> to vector<1x128xf32>
    %24 = vector.broadcast %23 : vector<1x128xf32> to vector<8x128xf32>
    %25 = arith.cmpf oeq, %21, %24 : vector<8x128xf32>
    %c8_i32_10 = arith.constant 8 : i32
    %26 = vector.broadcast %c8_i32_10 : i32 to vector<8x128xi32>
    %27 = arith.select %25, %3, %26 : vector<8x128xi1>, vector<8x128xi32>
    %cst_11 = arith.constant dense<2147483647> : vector<128xi32>
    %28 = vector.multi_reduction <minsi>, %27, %cst_11 [0] : vector<8x128xi32> to vector<128xi32>
    %29 = vector.shape_cast %28 : vector<128xi32> to vector<1x128xi32>
    %30 = vector.broadcast %29 : vector<1x128xi32> to vector<8x128xi32>
    %31 = arith.cmpi eq, %3, %30 : vector<8x128xi32>
    %32 = arith.subf %23, %6 : vector<1x128xf32>
    %33 = math.exp %32 : vector<1x128xf32>
    %34 = arith.addf %16, %33 : vector<1x128xf32>
    %35 = vector.shape_cast %33 : vector<1x128xf32> to vector<1x128xf32>
    %36 = vector.broadcast %35 : vector<1x128xf32> to vector<8x128xf32>
    %37 = arith.select %31, %36, %19 : vector<8x128xi1>, vector<8x128xf32>
    %38 = tpu.concatenate %12, %29 in 0 : vector<1x128xi32>, vector<1x128xi32> -> vector<2x128xi32>
    %c0_12 = arith.constant 0 : index
    %c0_13 = arith.constant 0 : index
    %39 = vector.load %arg4[%c0_12, %c0_13] : memref<2x128xi32, #tpu.memory_space<vmem>>, vector<2x128xi32>
    tpu.vector_store %arg4[%c0_12, %c0_13], %38 {strides = array<i32>} : memref<2x128xi32, #tpu.memory_space<vmem>>, vector<2x128xi32>,
    %40 = tpu.concatenate %6, %23 in 0 : vector<1x128xf32>, vector<1x128xf32> -> vector<2x128xf32>
    %c0_14 = arith.constant 0 : index
    %c0_15 = arith.constant 0 : index
    %41 = vector.load %arg5[%c0_14, %c0_15] : memref<2x128xf32, #tpu.memory_space<vmem>>, vector<2x128xf32>
    tpu.vector_store %arg5[%c0_14, %c0_15], %40 {strides = array<i32>} : memref<2x128xf32, #tpu.memory_space<vmem>>, vector<2x128xf32>,
    %42 = tpu.reciprocal %34 : vector<1x128xf32> -> vector<1x128xf32>
    %43 = vector.broadcast %42 : vector<1x128xf32> to vector<8x128xf32>
    %44 = arith.mulf %37, %43 : vector<8x128xf32>
    %c0_16 = arith.constant 0 : index
    %c0_17 = arith.constant 0 : index
    %45 = vector.load %arg3[%c0_16, %c0_17] : memref<8x128xf32, #tpu.memory_space<vmem>>, vector<8x128xf32>
    tpu.vector_store %arg3[%c0_16, %c0_17], %44 {strides = array<i32>} : memref<8x128xf32, #tpu.memory_space<vmem>>, vector<8x128xf32>,
    return
  }
  func.func @transform_0(%arg0: i32) -> (i32, i32) {
    %c0_i32 = arith.constant 0 : i32
    %c0_i32_0 = arith.constant 0 : i32
    return %arg0, %c0_i32 : i32, i32
  }
  func.func @transform_1(%arg0: i32) -> (i32, i32) {
    %c0_i32 = arith.constant 0 : i32
    %c0_i32_0 = arith.constant 0 : i32
    %c0_i32_1 = arith.constant 0 : i32
    return %c0_i32, %c0_i32_0 : i32, i32
  }
  func.func @transform_2(%arg0: i32) -> (i32, i32) {
    %c0_i32 = arith.constant 0 : i32
    %c0_i32_0 = arith.constant 0 : i32
    return %c0_i32, %arg0 : i32, i32
  }
  func.func @transform_3(%arg0: i32) -> (i32, i32) {
    %c0_i32 = arith.constant 0 : i32
    %c0_i32_0 = arith.constant 0 : i32
    return %c0_i32, %arg0 : i32, i32
  }
  func.func @transform_4(%arg0: i32) -> (i32, i32) {
    %c0_i32 = arith.constant 0 : i32
    %c0_i32_0 = arith.constant 0 : i32
    return %c0_i32, %arg0 : i32, i32
  }
}

</mosaic_0001>

<bundles_post_ra>
// kernel: tpu_custom_call.1
= control target key start
LH: loop header
LB: loop body
LE: loop exit
PB: predicated region body
PF: predicated region fallthrough
CT: control target
= control target key end

     0   :  { %10 = vsyncpa [#allocation3], 0  ;;  %s655_s0 = inlined_call_operand.hbm [shape: f32[128,32], index: 0, kind: input, shape index: {}]   ;;  %s656_s1 = inlined_call_operand.hbm [shape: f32[8,32], index: 1, kind: input, shape index: {}]   ;;  %s657_s2 = inlined_call_operand.hbm [shape: f32[8,128], index: 2, kind: output, shape index: {0}]   ;;  %s658_s3 = inlined_call_operand.hbm [shape: s32[2,128], index: 3, kind: output, shape index: {1}]   ;;  %s659_s4 = inlined_call_operand.hbm [shape: f32[2,128], index: 4, kind: output, shape index: {2}]  }
   0x1   :  { %11 = vsyncpa [#allocation6], 0 }
   0x2   :  { %12 = vsyncpa [#allocation4], 0 }
   0x3   :  { %13 = vsyncpa [#allocation9], 0  ;;  %s510_s15 = smov [#allocation2]   ;;  %s392_s19 = scalar_lea.hbm %s655_s0, 2048 }
   0x4   :  { %s19_s16 = sshll.u32 %s510_s15, 4  ;;  %p393_p0 = scmp.ne.s32.totalorder %s655_s0, %s392_s19  ;;  %s20_s16 = int_to_ptr.vmem [resolvable:$true] %s19_s16 }
   0x5   :  { %p396_p1 = scmp.lt.u32.totalorder %s392_s19, %s655_s0 }
   0x7   :  { %p398_p2 = pnand %p396_p1, %p393_p0 }
   0x9   :  { %401 = shalt.err (!%p398_p2)
}
   0xa   :  { %s402_s24 = scalar_lea.vmem %s20_s16, 2048  ;;  %p407_p4 = scmp.lt.s32.totalorder %s20_s16, %s20_s16 }
   0xb   :  { %p403_p3 = scmp.ne.s32.totalorder %s20_s16, %s402_s24  ;;  %p408_p5 = scmp.lt.s32.totalorder %s402_s24, %s402_s24 }
   0xd   :  { %p409_p6 = por %p408_p5, %p407_p4 }
   0xf   :  { %p410_p7 = pnand %p409_p6, %p403_p3 }
  0x11   :  { %413 = shalt.err (!%p410_p7)
}
  0x12   :  { %s511_s25 = smov 128   ;;  %s512_s26 = smov 8  }
  0x13   :  { %25 = dma.hbm_to_vmem [thread:$0]  %s655_s0, 2048, %s20_s16, [#allocation3], %s511_s25, %s511_s25, %s512_s26  }
  0x14   :  { %s513_s29 = smov [#allocation5]   ;;  %s414_s7 = scalar_lea.hbm %s656_s1, 128 }
  0x15   :  { %s32_s30 = sshll.u32 %s513_s29, 4  ;;  %p415_p8 = scmp.ne.s32.totalorder %s656_s1, %s414_s7  ;;  %s33_s30 = int_to_ptr.vmem [resolvable:$true] %s32_s30 }
  0x16   :  { %p418_p9 = scmp.lt.u32.totalorder %s414_s7, %s656_s1 }
  0x18   :  { %p420_p10 = pnand %p418_p9, %p415_p8 }
  0x1a   :  { %423 = shalt.err (!%p420_p10)
}
  0x1b   :  { %s424_s12 = scalar_lea.vmem %s33_s30, 128  ;;  %p429_p12 = scmp.lt.s32.totalorder %s33_s30, %s33_s30 }
  0x1c   :  { %p425_p11 = scmp.ne.s32.totalorder %s33_s30, %s424_s12  ;;  %p430_p13 = scmp.lt.s32.totalorder %s424_s12, %s424_s12 }
  0x1e   :  { %p431_p0 = por %p430_p13, %p429_p12 }
  0x20   :  { %p432_p1 = pnand %p431_p0, %p425_p11 }
  0x22   :  { %435 = shalt.err (!%p432_p1)
}
  0x23   :  { %35 = dma.hbm_to_vmem [thread:$0]  %s656_s1, 128, %s33_s30, [#allocation6]  }
  0x24   :  { %502 = dma.done.wait [#allocation3], 2048  }
  0x25   :  { %503 = vsyncadd [#allocation3], 4294965248 }
  0x26   :  { %504 = dma.done.wait [#allocation6], 128  }
  0x27   :  { %505 = vsyncadd [#allocation6], 4294967168  ;;  %v514_v0 = vmov 0.0|0.0   ;;  %vm515_vm0 = vmmov 0   ;;  %v516_v1 = vmov 0.0   ;;  %vm59_vm1 = vcmask 261120  }
  0x28   :  { %346 = vmatprep.subr.bf16.mxu0 %v514_v0  ;;  %343 = vmatprep.mubr.msk.f32.mxu0 %vm515_vm0, %v516_v1  ;;  %v43_v2 = vld [vmem:[#allocation2] sm:$0xff]  ;;  %v44_v3 = vld [vmem:[#allocation2 + $0x8] sm:$0xff]  ;;  %vm572_vm2 = vmpackc.low %vm59_vm1, %vm59_vm1  ;;  %v181_v33 = vlaneseq  ;;  %vm226_vm8 = vcmask 1040384   ;;  %s517_s1 = smov [#allocation8]   ;;  %s518_s15 = smov [#allocation10]  }
  0x29   :  { %v347_v5 = vpack.c.bf16 %v44_v3, %v43_v2  ;;  %v45_v6 = vld [vmem:[#allocation2 + $0x10] sm:$0xff]  ;;  %v46_v7 = vld [vmem:[#allocation2 + $0x18] sm:$0xff]  ;;  %v47_v9 = vld [vmem:[#allocation2 + $0x20] sm:$0xff]  ;;  %s250_s14 = sshll.u32 %s517_s1, 4  ;;  %s260_s16 = sshll.u32 %s518_s15, 4  ;;  %s251_s14 = int_to_ptr.vmem [resolvable:$true] %s250_s14  ;;  %s607_s16 = int_to_ptr.vmem [resolvable:$true] %s260_s16 }
  0x2a   :  { %v351_v8 = vpack.c.bf16 %v46_v7, %v45_v6  ;;  %v48_v10 = vld [vmem:[#allocation2 + $0x28] sm:$0xff]  ;;  %v49_v12 = vld [vmem:[#allocation2 + $0x30] sm:$0xff]  ;;  %v50_v13 = vld [vmem:[#allocation2 + $0x38] sm:$0xff]  ;;  %v593_v36 = vshrl.u32 %v181_v33, 7  ;;  %s436_s17 = scalar_lea.vmem %s251_s14, 32  ;;  %p441_p3 = scmp.lt.s32.totalorder %s251_s14, %s251_s14 }
  0x2b   :  { %349 = vmatpush3.bf16.xpose.msk.msra.mxu0 %vm572_vm2, %v347_v5  ;;  %v355_v11 = vpack.c.bf16 %v48_v10, %v47_v9  ;;  %v359_v14 = vpack.c.bf16 %v50_v13, %v49_v12  ;;  %v51_v15 = vld [vmem:[#allocation2 + $0x40] sm:$0xff]  ;;  %v52_v16 = vld [vmem:[#allocation2 + $0x48] sm:$0xff]  ;;  %v53_v18 = vld [vmem:[#allocation2 + $0x50] sm:$0xff]  ;;  %p437_p2 = scmp.ne.s32.totalorder %s251_s14, %s436_s17  ;;  %p442_p4 = scmp.lt.s32.totalorder %s436_s17, %s436_s17 }
  0x2c   :  { %350 = vmatprep.subr.bf16.mxu0 %v514_v0  ;;  %v363_v17 = vpack.c.bf16 %v52_v16, %v51_v15  ;;  %v54_v19 = vld [vmem:[#allocation2 + $0x58] sm:$0xff]  ;;  %v55_v21 = vld [vmem:[#allocation2 + $0x60] sm:$0xff]  ;;  %v56_v22 = vld [vmem:[#allocation2 + $0x68] sm:$0xff] }
  0x2d   :  { %v367_v20 = vpack.c.bf16 %v54_v19, %v53_v18  ;;  %v371_v23 = vpack.c.bf16 %v56_v22, %v55_v21  ;;  %v57_v24 = vld [vmem:[#allocation2 + $0x70] sm:$0xff]  ;;  %v58_v25 = vld [vmem:[#allocation2 + $0x78] sm:$0xff]  ;;  %v42_v27 = vld [vmem:[#allocation5] sm:$0xff]  ;;  %p443_p5 = por %p442_p4, %p441_p3 }
  0x2e   :  { %v375_v26 = vpack.c.bf16 %v58_v25, %v57_v24 }
  0x2f   :  { %p444_p6 = pnand %p443_p5, %p437_p2 }
  0x33   :  { %353 = vmatpush3.bf16.xpose.msk.msra.mxu0 %vm572_vm2, %v351_v8 }
  0x34   :  { %354 = vmatprep.subr.bf16.mxu0 %v514_v0 }
  0x3b   :  { %357 = vmatpush3.bf16.xpose.msk.msra.mxu0 %vm572_vm2, %v355_v11 }
  0x3c   :  { %358 = vmatprep.subr.bf16.mxu0 %v514_v0 }
  0x43   :  { %361 = vmatpush3.bf16.xpose.msk.msra.mxu0 %vm572_vm2, %v359_v14 }
  0x44   :  { %362 = vmatprep.subr.bf16.mxu0 %v514_v0 }
  0x4b   :  { %365 = vmatpush3.bf16.xpose.msk.msra.mxu0 %vm572_vm2, %v363_v17 }
  0x4c   :  { %366 = vmatprep.subr.bf16.mxu0 %v514_v0 }
  0x53   :  { %369 = vmatpush3.bf16.xpose.msk.msra.mxu0 %vm572_vm2, %v367_v20 }
  0x54   :  { %370 = vmatprep.subr.bf16.mxu0 %v514_v0 }
  0x5b   :  { %373 = vmatpush3.bf16.xpose.msk.msra.mxu0 %vm572_vm2, %v371_v23 }
  0x5c   :  { %374 = vmatprep.subr.bf16.mxu0 %v514_v0 }
  0x63   :  { %377 = vmatpush3.bf16.xpose.msk.msra.mxu0 %vm572_vm2, %v375_v26 }
  0x6a   :  { %344 = vmatmul.mubr.msk.f32.vlgmr.msra.gmra.mrb[0].mxu0 %vm59_vm1, %v42_v27 }
 0x13d   :  { %v177_v28 = vpop.f32.mrb[0].mxu0 }
 0x13e   :  { %v183_v29 = vrot.slane %v177_v28, 4  ;;  %v345_v30 = vpop.f32.mrb[1].mxu0 }
 0x140   :  { %v184_v31 = vmax.f32 %v177_v28, %v183_v29 }
 0x142   :  { %v185_v32 = vrot.slane %v184_v31, 2 }
 0x144   :  { %v186_v34 = vmax.f32 %v184_v31, %v185_v32 }
 0x146   :  { %v187_v35 = vrot.slane %v186_v34, 1 }
 0x148   :  { %v188_v37 = vmax.f32 %v186_v34, %v187_v35 }
 0x14a   :  { %vm189_vm3 = vcmp.eq.f32.partialorder %v177_v28, %v188_v37 }
 0x14b   :  { %v190_v38 = vsel %vm189_vm3, %v593_v36, 8 }
 0x14c   :  { %v191_v39 = vrot.slane %v190_v38, 4 }
 0x14e   :  { %vm192_vm4 = vcmp.lt.s32.totalorder %v190_v38, %v191_v39 }
 0x14f   :  { %v193_v40 = vsel %vm192_vm4, %v190_v38, %v191_v39 }
 0x150   :  { %v194_v41 = vrot.slane %v193_v40, 2 }
 0x152   :  { %vm195_vm5 = vcmp.lt.s32.totalorder %v193_v40, %v194_v41 }
 0x153   :  { %v196_v42 = vsel %vm195_vm5, %v193_v40, %v194_v41 }
 0x154   :  { %v197_v43 = vrot.slane %v196_v42, 1 }
 0x156   :  { %vm198_vm6 = vcmp.lt.s32.totalorder %v196_v42, %v197_v43 }
 0x157   :  { %v596_v44 = vsel %vm198_vm6, %v196_v42, %v197_v43 }
 0x158   :  { %vm200_vm7 = vcmp.eq.s32.totalorder %v593_v36, %v596_v44 }
 0x159   :  { %v202_v45 = vsel %vm200_vm7, -inf, %v177_v28 }
 0x15a   :  { %v203_v46 = vrot.slane %v202_v45, 4 }
 0x15c   :  { %v204_v47 = vmax.f32 %v202_v45, %v203_v46 }
 0x15e   :  { %v205_v48 = vrot.slane %v204_v47, 2 }
 0x160   :  { %v206_v49 = vmax.f32 %v204_v47, %v205_v48 }
 0x162   :  { %v207_v50 = vrot.slane %v206_v49, 1 }
 0x164   :  { %v208_v51 = vmax.f32 %v206_v49, %v207_v50 }
 0x166   :  { %vm209_vm9 = vcmp.eq.f32.partialorder %v202_v45, %v208_v51  ;;  %v221_v52 = vsub.f32 %v208_v51, %v188_v37  ;;  %v229_v53 = vsel %vm226_vm8, %v188_v37, %v208_v51 }
 0x167   :  { %v210_v54 = vsel %vm209_vm9, %v593_v36, 8  ;;  %230 = vst [vmem:[#allocation10] sm:$0x3] %v229_v53 }
 0x168   :  { %v211_v55 = vrot.slane %v210_v54, 4  ;;  %v222_v56 = vmul.f32 1.442695, %v221_v52 }
 0x16a   :  { %vm212_vm10 = vcmp.lt.s32.totalorder %v210_v54, %v211_v55  ;;  %388 = vpow2.f32 %v222_v56 }
 0x16b   :  { %v213_v57 = vsel %vm212_vm10, %v210_v54, %v211_v55 }
 0x16c   :  { %v214_v58 = vrot.slane %v213_v57, 2 }
 0x16e   :  { %vm215_vm11 = vcmp.lt.s32.totalorder %v213_v57, %v214_v58 }
 0x16f   :  { %v216_v59 = vsel %vm215_vm11, %v213_v57, %v214_v58 }
 0x170   :  { %v217_v60 = vrot.slane %v216_v59, 1 }
 0x172   :  { %vm218_vm12 = vcmp.lt.s32.totalorder %v216_v59, %v217_v60 }
 0x173   :  { %v219_v61 = vsel %vm218_vm12, %v216_v59, %v217_v60 }
 0x174   :  { %v389_v62 = vpop.eup %388  ;;  %v227_v63 = vsel %vm226_vm8, %v596_v44, %v219_v61 }
 0x175   :  { %228 = vst [vmem:[#allocation8] sm:$0x3] %v227_v63  ;;  %v224_v0 = vadd.f32 1.0, %v389_v62 }
 0x176   :  { %447 = shalt.err (!%p444_p6)
}
 0x177   :  { %s448_s20 = scalar_lea.hbm %s658_s3, 32 }
 0x178   :  { %p449_p7 = scmp.ne.s32.totalorder %s658_s3, %s448_s20  ;;  %p452_p8 = scmp.lt.u32.totalorder %s448_s20, %s658_s3 }
 0x17a   :  { %p454_p9 = pnand %p452_p8, %p449_p7 }
 0x17c   :  { %457 = shalt.err (!%p454_p9)
}
 0x17d   :  { %253 = dma.vmem_to_hbm [thread:$0]  %s251_s14, 32, %s658_s3, [#allocation9]   ;;  %390 = vrcp.f32 %v224_v0 }
 0x17e   :  { %s458_s27 = scalar_lea.vmem %s607_s16, 32  ;;  %p463_p11 = scmp.lt.s32.totalorder %s607_s16, %s607_s16 }
 0x17f   :  { %p459_p10 = scmp.ne.s32.totalorder %s607_s16, %s458_s27  ;;  %p464_p12 = scmp.lt.s32.totalorder %s458_s27, %s458_s27 }
 0x181   :  { %p465_p13 = por %p464_p12, %p463_p11 }
 0x183   :  { %p466_p0 = pnand %p465_p13, %p459_p10 }
 0x185   :  { %469 = shalt.err (!%p466_p0)
}
 0x186   :  { %s470_s30 = scalar_lea.hbm %s659_s4, 32 }
 0x187   :  { %p471_p1 = scmp.ne.s32.totalorder %s659_s4, %s470_s30  ;;  %p474_p2 = scmp.lt.u32.totalorder %s470_s30, %s659_s4 }
 0x189   :  { %p476_p3 = pnand %p474_p2, %p471_p1 }
 0x18b   :  { %479 = shalt.err (!%p476_p3)
}
 0x18c   :  { %263 = dma.vmem_to_hbm [thread:$0]  %s607_s16, 32, %s659_s4, [#allocation9]   ;;  %vm220_vm13 = vcmp.eq.s32.totalorder %v593_v36, %v219_v61  ;;  %v201_v2 = vsel %vm200_vm7, 1.0, %v516_v1  ;;  %v391_v3 = vpop.eup %390 }
 0x18d   :  { %s519_s10 = smov [#allocation7]   ;;  %v225_v4 = vsel %vm220_vm13, %v389_v62, %v201_v2 }
 0x18e   :  { %s240_s11 = sshll.u32 %s519_s10, 4  ;;  %v232_v5 = vmul.f32 %v391_v3, %v225_v4  ;;  %s241_s11 = int_to_ptr.vmem [resolvable:$true] %s240_s11 }
 0x18f   :  { %s480_s12 = scalar_lea.vmem %s241_s11, 128  ;;  %p485_p5 = scmp.lt.s32.totalorder %s241_s11, %s241_s11 }
 0x190   :  { %233 = vst [vmem:[#allocation7] sm:$0xff] %v232_v5  ;;  %p481_p4 = scmp.ne.s32.totalorder %s241_s11, %s480_s12  ;;  %p486_p6 = scmp.lt.s32.totalorder %s480_s12, %s480_s12 }
 0x192   :  { %p487_p7 = por %p486_p6, %p485_p5 }
 0x194   :  { %p488_p8 = pnand %p487_p7, %p481_p4 }
 0x196   :  { %491 = shalt.err (!%p488_p8)
}
 0x197   :  { %s492_s13 = scalar_lea.hbm %s657_s2, 128 }
 0x198   :  { %p493_p9 = scmp.ne.s32.totalorder %s657_s2, %s492_s13  ;;  %p496_p10 = scmp.lt.u32.totalorder %s492_s13, %s657_s2 }
 0x19a   :  { %p498_p11 = pnand %p496_p10, %p493_p9 }
 0x19c   :  { %501 = shalt.err (!%p498_p11)
}
 0x19d   :  { %243 = dma.vmem_to_hbm [thread:$0]  %s241_s11, 128, %s657_s2, [#allocation4]  }
 0x19e   :  { %506 = dma.done.wait [#allocation4], 128  }
 0x19f   :  { %507 = vsyncadd [#allocation4], 4294967168 }
 0x1a0   :  { %508 = dma.done.wait [#allocation9], 64  }
 0x1a1   :  { %509 = vsyncadd [#allocation9], 4294967232 }
 0x1a2   :  { %273 = vsyncpa [#allocation3], 1 }
 0x1a3   :  { %274 = vsyncpa [#allocation6], 1 }
 0x1a4   :  { %275 = vsyncpa [#allocation4], 1 }
 0x1a5   :  { %276 = vsyncpa [#allocation9], 1 }

</bundles_post_ra>
